<compile_context>
chip_gen: v6e
topology: v6e:2x2x1
jax: 0.10.0
libtpu: 0.0.40
codegen_flags: <defaults>
</compile_context>

<pallas_src>
import functools

import jax
import jax.numpy as jnp
from jax import lax
from jax.experimental import pallas as pl
from jax.experimental.pallas import tpu as pltpu

INPUT_SIZE = 28
HIDDEN_SIZE = 128
OUT_SIZE = 10


def _rnn_kernel(x_ref, wih_ref, whh_ref, b_ref, wout_ref, bout_ref, out_ref,
                *, batch, seq_len):
    """Whole forward in one grid step.

    x_ref    : (T*B, I)  bf16  seq-major flattened input (rows t*B .. t*B+B-1 = timestep t)
    wih_ref  : (I, H)    bf16  W_ih^T
    whh_ref  : (H, H)    bf16  W_hh^T
    b_ref    : (1, H)    f32   b_ih + b_hh
    wout_ref : (H, O)    bf16  W_out^T
    bout_ref : (1, O)    f32   b_out
    out_ref  : (B, O)    f32   logits
    """
    B, T = batch, seq_len

    # Hoist every VMEM -> vreg load out of the recurrence (read once, reuse).
    x = x_ref[...]
    wih = wih_ref[...]
    whh = whh_ref[...]
    wout = wout_ref[...]
    b = b_ref[...]
    bout = bout_ref[...]

    # Phase 1: input projection for every timestep in ONE MXU matmul
    # (no sequential dependence -> off the serial path, fills MXU rows).
    u = jnp.dot(x, wih, preferred_element_type=jnp.float32) + b   # (T*B, H) f32

    # Phase 2: serial tanh recurrence, fully unrolled (T is small and static).
    H = whh.shape[1]
    h = jnp.zeros((B, H), jnp.float32)
    for t in range(T):
        u_t = u[t * B:(t + 1) * B, :]                              # static slice (B, H)
        pre = u_t + jnp.dot(h.astype(whh.dtype), whh,
                            preferred_element_type=jnp.float32)
        h = jnp.tanh(pre)     # activation math stays f32 (v5e: no bf16 VPU/EUP)

    # Phase 3: Linear(H -> O) on the last hidden state.
    logits = jnp.dot(h.astype(wout.dtype), wout,
                     preferred_element_type=jnp.float32) + bout
    out_ref[...] = logits.astype(out_ref.dtype)


def rnn_forward(x_btI, params):
    """x_btI: (B, T, I) batch_first input, like the PyTorch module. Returns (B, O)."""
    w_ih, w_hh, b_ih, b_hh, w_out, b_out = params
    B, T, I = x_btI.shape
    H = w_ih.shape[0]
    O = w_out.shape[0]
    if T < 1:
        raise ValueError("sequence length must be >= 1")

    # Glue: seq-major flatten + bf16 cast of MXU operands; biases stay f32.
    x_flat = (jnp.transpose(x_btI, (1, 0, 2))
              .reshape(T * B, I)
              .astype(jnp.bfloat16))                      # (T*B, I)
    wih_t = jnp.transpose(w_ih).astype(jnp.bfloat16)      # (I, H)
    whh_t = jnp.transpose(w_hh).astype(jnp.bfloat16)      # (H, H)
    wout_t = jnp.transpose(w_out).astype(jnp.bfloat16)    # (H, O)
    b = (b_ih + b_hh).reshape(1, H).astype(jnp.float32)   # (1, H)
    bout = b_out.reshape(1, O).astype(jnp.float32)        # (1, O)

    kernel = functools.partial(_rnn_kernel, batch=B, seq_len=T)

    grid_spec = pltpu.PrefetchScalarGridSpec(
        num_scalar_prefetch=0,
        grid=(1,),  # everything fits in VMEM; single grid step, loop in-kernel
        in_specs=[
            pl.BlockSpec((T * B, I), lambda i: (0, 0)),   # full input, resident
            pl.BlockSpec((I, H), lambda i: (0, 0)),       # W_ih^T
            pl.BlockSpec((H, H), lambda i: (0, 0)),       # W_hh^T
            pl.BlockSpec((1, H), lambda i: (0, 0)),       # b_ih + b_hh
            pl.BlockSpec((H, O), lambda i: (0, 0)),       # W_out^T
            pl.BlockSpec((1, O), lambda i: (0, 0)),       # b_out
        ],
        out_specs=pl.BlockSpec((B, O), lambda i: (0, 0)),
    )

    # TODO(synk): if B grows, add a leading "parallel" batch grid axis so v7x's
    # second TensorCore gets work; at B=2 it would be pure overhead.
    return pl.pallas_call(
        kernel,
        out_shape=jax.ShapeDtypeStruct((B, O), jnp.float32),
        grid_spec=grid_spec,
        compiler_params=pltpu.CompilerParams(
            dimension_semantics=("arbitrary",)),
    )(x_flat, wih_t, whh_t, b, wout_t, bout)


def init_params(key):
    """Deterministic init matching torch.nn.RNN / Linear shapes
    (U(-1/sqrt(fan), 1/sqrt(fan)) like PyTorch default)."""
    ks = jax.random.split(key, 6)
    k_rnn = 1.0 / jnp.sqrt(HIDDEN_SIZE)
    k_lin = 1.0 / jnp.sqrt(HIDDEN_SIZE)
    w_ih = jax.random.uniform(ks[0], (HIDDEN_SIZE, INPUT_SIZE), jnp.float32, -k_rnn, k_rnn)
    w_hh = jax.random.uniform(ks[1], (HIDDEN_SIZE, HIDDEN_SIZE), jnp.float32, -k_rnn, k_rnn)
    b_ih = jax.random.uniform(ks[2], (HIDDEN_SIZE,), jnp.float32, -k_rnn, k_rnn)
    b_hh = jax.random.uniform(ks[3], (HIDDEN_SIZE,), jnp.float32, -k_rnn, k_rnn)
    w_out = jax.random.uniform(ks[4], (OUT_SIZE, HIDDEN_SIZE), jnp.float32, -k_lin, k_lin)
    b_out = jax.random.uniform(ks[5], (OUT_SIZE,), jnp.float32, -k_lin, k_lin)
    return (w_ih, w_hh, b_ih, b_hh, w_out, b_out)


def rnn_reference(x_btI, params):
    """Pure-JAX f32 reference of the PyTorch forward (tanh RNN + Linear on last step)."""
    w_ih, w_hh, b_ih, b_hh, w_out, b_out = params
    B, T, I = x_btI.shape
    h = jnp.zeros((B, HIDDEN_SIZE), jnp.float32)

    def step(h, x_t):
        h = jnp.tanh(x_t @ w_ih.T + b_ih + h @ w_hh.T + b_hh)
        return h, None

    h, _ = lax.scan(step, h, jnp.transpose(x_btI, (1, 0, 2)))
    return h @ w_out.T + b_out


if __name__ == "__main__":
    key = jax.random.PRNGKey(0)
    kp, kx = jax.random.split(key)
    params = init_params(kp)

    B, T = 2, 8
    x = jax.random.normal(kx, (B, T, INPUT_SIZE), jnp.float32)

    out = rnn_forward(x, params)
    out = jax.block_until_ready(out)

    ref = rnn_reference(x, params)
    assert out.shape == (B, OUT_SIZE), out.shape
    max_err = float(jnp.max(jnp.abs(out - ref)))
    # Loose tolerance vs. full-f32 reference: MXU operands are bf16 (f32 accum).
    assert jnp.allclose(out, ref, rtol=5e-2, atol=5e-2), (
        "mismatch vs reference: max abs err = %g" % max_err)

    print("KERNEL_OK")
</pallas_src>

<mosaic_0001>
module attributes {stable_mosaic.version = 11 : i64} {
  func.func @_rnn_kernel(%arg0: i32, %arg1: memref<16x28xbf16, #tpu.memory_space<vmem>>, %arg2: memref<28x128xbf16, #tpu.memory_space<vmem>>, %arg3: memref<128x128xbf16, #tpu.memory_space<vmem>>, %arg4: memref<1x128xf32, #tpu.memory_space<vmem>>, %arg5: memref<128x10xbf16, #tpu.memory_space<vmem>>, %arg6: memref<1x10xf32, #tpu.memory_space<vmem>>, %arg7: memref<2x10xf32, #tpu.memory_space<vmem>>) attributes {dimension_semantics = [#tpu.dimension_semantics<arbitrary>], iteration_bounds = array<i64: 1>, scalar_prefetch = 0 : i64, scratch_operands = 0 : i64, tpu.core_type = #tpu.core_type<tc>, window_params = [{pipeline_mode = #tpu.pipeline_mode<synchronous>, transform_indices = @transform_0, window_bounds = array<i64: 16, 28>}, {pipeline_mode = #tpu.pipeline_mode<synchronous>, transform_indices = @transform_1, window_bounds = array<i64: 28, 128>}, {pipeline_mode = #tpu.pipeline_mode<synchronous>, transform_indices = @transform_2, window_bounds = array<i64: 128, 128>}, {pipeline_mode = #tpu.pipeline_mode<synchronous>, transform_indices = @transform_3, window_bounds = array<i64: 1, 128>}, {pipeline_mode = #tpu.pipeline_mode<synchronous>, transform_indices = @transform_4, window_bounds = array<i64: 128, 10>}, {pipeline_mode = #tpu.pipeline_mode<synchronous>, transform_indices = @transform_5, window_bounds = array<i64: 1, 10>}, {pipeline_mode = #tpu.pipeline_mode<synchronous>, transform_indices = @transform_6, window_bounds = array<i64: 2, 10>}]} {
    %c0 = arith.constant 0 : index
    %c0_0 = arith.constant 0 : index
    %0 = vector.load %arg1[%c0, %c0_0] : memref<16x28xbf16, #tpu.memory_space<vmem>>, vector<16x28xbf16>
    %c0_1 = arith.constant 0 : index
    %c0_2 = arith.constant 0 : index
    %1 = vector.load %arg2[%c0_1, %c0_2] : memref<28x128xbf16, #tpu.memory_space<vmem>>, vector<28x128xbf16>
    %c0_3 = arith.constant 0 : index
    %c0_4 = arith.constant 0 : index
    %2 = vector.load %arg3[%c0_3, %c0_4] : memref<128x128xbf16, #tpu.memory_space<vmem>>, vector<128x128xbf16>
    %c0_5 = arith.constant 0 : index
    %c0_6 = arith.constant 0 : index
    %3 = vector.load %arg5[%c0_5, %c0_6] : memref<128x10xbf16, #tpu.memory_space<vmem>>, vector<128x10xbf16>
    %c0_7 = arith.constant 0 : index
    %c0_8 = arith.constant 0 : index
    %4 = vector.load %arg4[%c0_7, %c0_8] : memref<1x128xf32, #tpu.memory_space<vmem>>, vector<1x128xf32>
    %c0_9 = arith.constant 0 : index
    %c0_10 = arith.constant 0 : index
    %5 = vector.load %arg6[%c0_9, %c0_10] : memref<1x10xf32, #tpu.memory_space<vmem>>, vector<1x10xf32>
    %cst = arith.constant dense<0.000000e+00> : vector<16x128xf32>
    %6 = tpu.matmul %0, %1, %cst {dimension_numbers = #tpu.dot_dimension_numbers<[1], [0], [0], [1], [0, 0, 1, 1], [], []>} : vector<16x28xbf16>, vector<28x128xbf16>, vector<16x128xf32> -> vector<16x128xf32>
    %7 = vector.broadcast %4 : vector<1x128xf32> to vector<16x128xf32>
    %8 = arith.addf %6, %7 : vector<16x128xf32>
    %cst_11 = arith.constant 0.000000e+00 : f32
    %9 = vector.broadcast %cst_11 : f32 to vector<2x128xf32>
    %10 = vector.extract_strided_slice %8 {offsets = [0, 0], sizes = [2, 128], strides = [1, 1]} : vector<16x128xf32> to vector<2x128xf32>
    %11 = arith.truncf %9 : vector<2x128xf32> to vector<2x128xbf16>
    %cst_12 = arith.constant dense<0.000000e+00> : vector<2x128xf32>
    %12 = tpu.matmul %11, %2, %cst_12 {dimension_numbers = #tpu.dot_dimension_numbers<[1], [0], [0], [1], [0, 0, 1, 1], [], []>} : vector<2x128xbf16>, vector<128x128xbf16>, vector<2x128xf32> -> vector<2x128xf32>
    %13 = arith.addf %10, %12 : vector<2x128xf32>
    %14 = math.tanh %13 : vector<2x128xf32>
    %15 = vector.extract_strided_slice %8 {offsets = [2, 0], sizes = [2, 128], strides = [1, 1]} : vector<16x128xf32> to vector<2x128xf32>
    %16 = arith.truncf %14 : vector<2x128xf32> to vector<2x128xbf16>
    %cst_13 = arith.constant dense<0.000000e+00> : vector<2x128xf32>
    %17 = tpu.matmul %16, %2, %cst_13 {dimension_numbers = #tpu.dot_dimension_numbers<[1], [0], [0], [1], [0, 0, 1, 1], [], []>} : vector<2x128xbf16>, vector<128x128xbf16>, vector<2x128xf32> -> vector<2x128xf32>
    %18 = arith.addf %15, %17 : vector<2x128xf32>
    %19 = math.tanh %18 : vector<2x128xf32>
    %20 = vector.extract_strided_slice %8 {offsets = [4, 0], sizes = [2, 128], strides = [1, 1]} : vector<16x128xf32> to vector<2x128xf32>
    %21 = arith.truncf %19 : vector<2x128xf32> to vector<2x128xbf16>
    %cst_14 = arith.constant dense<0.000000e+00> : vector<2x128xf32>
    %22 = tpu.matmul %21, %2, %cst_14 {dimension_numbers = #tpu.dot_dimension_numbers<[1], [0], [0], [1], [0, 0, 1, 1], [], []>} : vector<2x128xbf16>, vector<128x128xbf16>, vector<2x128xf32> -> vector<2x128xf32>
    %23 = arith.addf %20, %22 : vector<2x128xf32>
    %24 = math.tanh %23 : vector<2x128xf32>
    %25 = vector.extract_strided_slice %8 {offsets = [6, 0], sizes = [2, 128], strides = [1, 1]} : vector<16x128xf32> to vector<2x128xf32>
    %26 = arith.truncf %24 : vector<2x128xf32> to vector<2x128xbf16>
    %cst_15 = arith.constant dense<0.000000e+00> : vector<2x128xf32>
    %27 = tpu.matmul %26, %2, %cst_15 {dimension_numbers = #tpu.dot_dimension_numbers<[1], [0], [0], [1], [0, 0, 1, 1], [], []>} : vector<2x128xbf16>, vector<128x128xbf16>, vector<2x128xf32> -> vector<2x128xf32>
    %28 = arith.addf %25, %27 : vector<2x128xf32>
    %29 = math.tanh %28 : vector<2x128xf32>
    %30 = vector.extract_strided_slice %8 {offsets = [8, 0], sizes = [2, 128], strides = [1, 1]} : vector<16x128xf32> to vector<2x128xf32>
    %31 = arith.truncf %29 : vector<2x128xf32> to vector<2x128xbf16>
    %cst_16 = arith.constant dense<0.000000e+00> : vector<2x128xf32>
    %32 = tpu.matmul %31, %2, %cst_16 {dimension_numbers = #tpu.dot_dimension_numbers<[1], [0], [0], [1], [0, 0, 1, 1], [], []>} : vector<2x128xbf16>, vector<128x128xbf16>, vector<2x128xf32> -> vector<2x128xf32>
    %33 = arith.addf %30, %32 : vector<2x128xf32>
    %34 = math.tanh %33 : vector<2x128xf32>
    %35 = vector.extract_strided_slice %8 {offsets = [10, 0], sizes = [2, 128], strides = [1, 1]} : vector<16x128xf32> to vector<2x128xf32>
    %36 = arith.truncf %34 : vector<2x128xf32> to vector<2x128xbf16>
    %cst_17 = arith.constant dense<0.000000e+00> : vector<2x128xf32>
    %37 = tpu.matmul %36, %2, %cst_17 {dimension_numbers = #tpu.dot_dimension_numbers<[1], [0], [0], [1], [0, 0, 1, 1], [], []>} : vector<2x128xbf16>, vector<128x128xbf16>, vector<2x128xf32> -> vector<2x128xf32>
    %38 = arith.addf %35, %37 : vector<2x128xf32>
    %39 = math.tanh %38 : vector<2x128xf32>
    %40 = vector.extract_strided_slice %8 {offsets = [12, 0], sizes = [2, 128], strides = [1, 1]} : vector<16x128xf32> to vector<2x128xf32>
    %41 = arith.truncf %39 : vector<2x128xf32> to vector<2x128xbf16>
    %cst_18 = arith.constant dense<0.000000e+00> : vector<2x128xf32>
    %42 = tpu.matmul %41, %2, %cst_18 {dimension_numbers = #tpu.dot_dimension_numbers<[1], [0], [0], [1], [0, 0, 1, 1], [], []>} : vector<2x128xbf16>, vector<128x128xbf16>, vector<2x128xf32> -> vector<2x128xf32>
    %43 = arith.addf %40, %42 : vector<2x128xf32>
    %44 = math.tanh %43 : vector<2x128xf32>
    %45 = vector.extract_strided_slice %8 {offsets = [14, 0], sizes = [2, 128], strides = [1, 1]} : vector<16x128xf32> to vector<2x128xf32>
    %46 = arith.truncf %44 : vector<2x128xf32> to vector<2x128xbf16>
    %cst_19 = arith.constant dense<0.000000e+00> : vector<2x128xf32>
    %47 = tpu.matmul %46, %2, %cst_19 {dimension_numbers = #tpu.dot_dimension_numbers<[1], [0], [0], [1], [0, 0, 1, 1], [], []>} : vector<2x128xbf16>, vector<128x128xbf16>, vector<2x128xf32> -> vector<2x128xf32>
    %48 = arith.addf %45, %47 : vector<2x128xf32>
    %49 = math.tanh %48 : vector<2x128xf32>
    %50 = arith.truncf %49 : vector<2x128xf32> to vector<2x128xbf16>
    %cst_20 = arith.constant dense<0.000000e+00> : vector<2x10xf32>
    %51 = tpu.matmul %50, %3, %cst_20 {dimension_numbers = #tpu.dot_dimension_numbers<[1], [0], [0], [1], [0, 0, 1, 1], [], []>} : vector<2x128xbf16>, vector<128x10xbf16>, vector<2x10xf32> -> vector<2x10xf32>
    %52 = vector.broadcast %5 : vector<1x10xf32> to vector<2x10xf32>
    %53 = arith.addf %51, %52 : vector<2x10xf32>
    %c0_21 = arith.constant 0 : index
    %c0_22 = arith.constant 0 : index
    %54 = vector.load %arg7[%c0_21, %c0_22] : memref<2x10xf32, #tpu.memory_space<vmem>>, vector<2x10xf32>
    tpu.vector_store %arg7[%c0_21, %c0_22], %53 {strides = array<i32>} : memref<2x10xf32, #tpu.memory_space<vmem>>, vector<2x10xf32>,
    return
  }
  func.func @transform_0(%arg0: i32) -> (i32, i32) {
    %c0_i32 = arith.constant 0 : i32
    %c0_i32_0 = arith.constant 0 : i32
    %c0_i32_1 = arith.constant 0 : i32
    return %c0_i32, %c0_i32_0 : i32, i32
  }
  func.func @transform_1(%arg0: i32) -> (i32, i32) {
    %c0_i32 = arith.constant 0 : i32
    %c0_i32_0 = arith.constant 0 : i32
    %c0_i32_1 = arith.constant 0 : i32
    return %c0_i32, %c0_i32_0 : i32, i32
  }
  func.func @transform_2(%arg0: i32) -> (i32, i32) {
    %c0_i32 = arith.constant 0 : i32
    %c0_i32_0 = arith.constant 0 : i32
    %c0_i32_1 = arith.constant 0 : i32
    return %c0_i32, %c0_i32_0 : i32, i32
  }
  func.func @transform_3(%arg0: i32) -> (i32, i32) {
    %c0_i32 = arith.constant 0 : i32
    %c0_i32_0 = arith.constant 0 : i32
    %c0_i32_1 = arith.constant 0 : i32
    return %c0_i32, %c0_i32_0 : i32, i32
  }
  func.func @transform_4(%arg0: i32) -> (i32, i32) {
    %c0_i32 = arith.constant 0 : i32
    %c0_i32_0 = arith.constant 0 : i32
    %c0_i32_1 = arith.constant 0 : i32
    return %c0_i32, %c0_i32_0 : i32, i32
  }
  func.func @transform_5(%arg0: i32) -> (i32, i32) {
    %c0_i32 = arith.constant 0 : i32
    %c0_i32_0 = arith.constant 0 : i32
    %c0_i32_1 = arith.constant 0 : i32
    return %c0_i32, %c0_i32_0 : i32, i32
  }
  func.func @transform_6(%arg0: i32) -> (i32, i32) {
    %c0_i32 = arith.constant 0 : i32
    %c0_i32_0 = arith.constant 0 : i32
    %c0_i32_1 = arith.constant 0 : i32
    return %c0_i32, %c0_i32_0 : i32, i32
  }
}

</mosaic_0001>

<bundles_post_ra>
// kernel: tpu_custom_call.1
= control target key start
LH: loop header
LB: loop body
LE: loop exit
PB: predicated region body
PF: predicated region fallthrough
CT: control target
= control target key end

     0   :  { %11 = vsyncpa [#allocation3], 0  ;;  %s1360_s0 = inlined_call_operand.vmem [shape: bf16[16,28], index: 0, kind: input, shape index: {}]   ;;  %s1361_s1 = inlined_call_operand.hbm [shape: bf16[28,128], index: 1, kind: input, shape index: {}]   ;;  %s1362_s2 = inlined_call_operand.vmem [shape: bf16[128,128], index: 2, kind: input, shape index: {}]   ;;  %s1363_s3 = inlined_call_operand.vmem [shape: f32[1,128], index: 3, kind: input, shape index: {}]   ;;  %s1364_s4 = inlined_call_operand.vmem [shape: bf16[128,10], index: 4, kind: input, shape index: {}]   ;;  %s1365_s5 = inlined_call_operand.vmem [shape: f32[1,10], index: 5, kind: input, shape index: {}]   ;;  %s1366_s6 = inlined_call_operand.hbm [shape: f32[2,10], index: 6, kind: output, shape index: {}]  }
   0x1   :  { %12 = vsyncpa [#allocation4], 0  ;;  %s1069_s21 = smov [#allocation2]  }
   0x2   :  { %s20_s22 = sshll.u32 %s1069_s21, 4  ;;  %s21_s22 = int_to_ptr.vmem [resolvable:$true] %s20_s22 }
   0x3   :  { %s1033_s23 = scalar_lea.vmem %s21_s22, 256  ;;  %p1038_p1 = scmp.lt.s32.totalorder %s21_s22, %s21_s22 }
   0x4   :  { %p1034_p0 = scmp.ne.s32.totalorder %s21_s22, %s1033_s23  ;;  %p1039_p2 = scmp.lt.s32.totalorder %s1033_s23, %s1033_s23 }
   0x6   :  { %p1040_p3 = por %p1039_p2, %p1038_p1 }
   0x8   :  { %p1041_p4 = pnand %p1040_p3, %p1034_p0 }
   0xa   :  { %1044 = shalt.err (!%p1041_p4)
}
   0xb   :  { %s1070_s24 = smov 64   ;;  %s1071_s25 = smov 4  }
   0xc   :  { %26 = dma.hbm_to_vmem [thread:$0]  %s1361_s1, 256, %s21_s22, [#allocation3], %s1070_s24, %s1070_s24, %s1071_s25  }
   0xd   :  { %1065 = dma.done.wait [#allocation3], 256  }
   0xe   :  { %1066 = vsyncadd [#allocation3], 4294967040  ;;  %v1072_v0 = vmov 0.0   ;;  %vm1073_vm0 = vmmov 0   ;;  %v1123_v1 = vld [vmem:[%s1362_s2 + $0x38] sm:$0xff]   ;;  %v1129_v2 = vld [vmem:[%s1362_s2 + $0x30] sm:$0xff]  }
   0xf   :  { %803 = vmatprep.subr.bf16.mxu1 %v1072_v0  ;;  %795 = vmatprep.subr.bf16.mxu0 %v1072_v0  ;;  %vm105_vm1 = vcmask 1045504   ;;  %v994_v3 = vld [vmem:[#allocation2 + $0x8] sm:$0x3f]   ;;  %v996_v6 = vld [vmem:[#allocation2] sm:$0xff]   ;;  %vm101_vm2 = vcmask 228352   ;;  %v1153_v9 = vld [vmem:[%s1362_s2 + $0x18] sm:$0xff]  }
  0x10   :  { %799 = vmatprep.mubr.msk.bf16.mxu0 %vm1073_vm0, %v1072_v0  ;;  %819 = vmatprep.mubr.msk.bf16.mxu1 %vm1073_vm0, %v1072_v0  ;;  %v1136_v4 = vld [vmem:[%s1362_s2 + $0x28] sm:$0xff]   ;;  %v107_v5 = vsel %vm105_vm1, %v994_v3, 0  ;;  %v1143_v7 = vld [vmem:[%s1362_s2 + $0x20] sm:$0xff]   ;;  %v1166_v10 = vld [vmem:[%s1362_s2 + $0x10] sm:$0xff]   ;;  %v1074_v13 = vmov 0   ;;  %s1075_s13 = smov [#allocation5]  }
  0x11   :  { %804 = vmatpush3.bf16.msra.mxu1 %v1123_v1  ;;  %796 = vmatpush3.bf16.msra.mxu0 %v107_v5  ;;  %v998_v8 = vld [vmem:[%s1360_s0] sm:$0xff]   ;;  %v1175_v11 = vld [vmem:[%s1362_s2 + $0x8] sm:$0xff]   ;;  %s680_s14 = sshll.u32 %s1075_s13, 4  ;;  %vm672_vm3 = vcmask 74752   ;;  %s681_s14 = int_to_ptr.vmem [resolvable:$true] %s680_s14 }
  0x12   :  { %805 = vmatprep.subr.bf16.mxu1 %v1072_v0  ;;  %797 = vmatprep.subr.bf16.mxu0 %v1072_v0  ;;  %v1184_v12 = vld [vmem:[%s1362_s2] sm:$0xff]   ;;  %p1050_p6 = scmp.lt.s32.totalorder %s681_s14, %s681_s14 }
  0x13   :  { %v689_v15 = vld [vmem:[%s1363_s3] ss:$0 sm:$0xff] }
  0x15   :  { %806 = vmatpush3.bf16.msra.mxu1 %v1129_v2  ;;  %798 = vmatpush3.bf16.msra.mxu0 %v996_v6 }
  0x16   :  { %807 = vmatprep.subr.bf16.mxu1 %v1072_v0  ;;  %823 = vmatprep.subr.bf16.mxu0 %v1072_v0 }
  0x18   :  { %800 = vmatmul.mubr.msk.bf16.vlgmr.msra.gmra.mxu0 %vm101_vm2, %v998_v8  ;;  %v1001_v8 = vld [vmem:[%s1364_s4 + $0x38] sm:$0xff]  }
  0x19   :  { %808 = vmatpush3.bf16.msra.mxu1 %v1136_v4  ;;  %824 = vmatpush3.bf16.msra.mxu0 %v1123_v1 }
  0x1a   :  { %809 = vmatprep.subr.bf16.mxu1 %v1072_v0  ;;  %825 = vmatprep.subr.bf16.mxu0 %v1072_v0 }
  0x1b   :  { %839 = vmatprep.mubr.msk.bf16.mxu0 %vm1073_vm0, %v1072_v0 }
  0x1d   :  { %810 = vmatpush3.bf16.msra.mxu1 %v1143_v7  ;;  %826 = vmatpush3.bf16.msra.mxu0 %v1129_v2 }
  0x1e   :  { %811 = vmatprep.subr.bf16.mxu1 %v1072_v0  ;;  %827 = vmatprep.subr.bf16.mxu0 %v1072_v0 }
  0x21   :  { %812 = vmatpush3.bf16.msra.mxu1 %v1153_v9  ;;  %828 = vmatpush3.bf16.msra.mxu0 %v1136_v4 }
  0x22   :  { %813 = vmatprep.subr.bf16.mxu1 %v1072_v0  ;;  %829 = vmatprep.subr.bf16.mxu0 %v1072_v0 }
  0x25   :  { %814 = vmatpush3.bf16.msra.mxu1 %v1166_v10  ;;  %830 = vmatpush3.bf16.msra.mxu0 %v1143_v7 }
  0x26   :  { %815 = vmatprep.subr.bf16.mxu1 %v1072_v0  ;;  %831 = vmatprep.subr.bf16.mxu0 %v1072_v0 }
  0x29   :  { %816 = vmatpush3.bf16.msra.mxu1 %v1175_v11  ;;  %832 = vmatpush3.bf16.msra.mxu0 %v1153_v9 }
  0x2a   :  { %817 = vmatprep.subr.bf16.mxu1 %v1072_v0  ;;  %833 = vmatprep.subr.bf16.mxu0 %v1072_v0 }
  0x2d   :  { %818 = vmatpush3.bf16.msra.mxu1 %v1184_v12  ;;  %834 = vmatpush3.bf16.msra.mxu0 %v1166_v10 }
  0x2e   :  { %843 = vmatprep.subr.bf16.mxu1 %v1072_v0  ;;  %835 = vmatprep.subr.bf16.mxu0 %v1072_v0 }
  0x30   :  { %820 = vmatmul.mubr.bf16.vlgmr.msra.gmra.mxu1 %v1074_v13 }
  0x31   :  { %844 = vmatpush3.bf16.msra.mxu1 %v1123_v1  ;;  %859 = vmatprep.mubr.msk.bf16.mxu1 %vm1073_vm0, %v1072_v0 }
  0x32   :  { %845 = vmatprep.subr.bf16.mxu1 %v1072_v0  ;;  %836 = vmatpush3.bf16.msra.mxu0 %v1175_v11 }
  0x33   :  { %837 = vmatprep.subr.bf16.mxu0 %v1072_v0 }
  0x35   :  { %846 = vmatpush3.bf16.msra.mxu1 %v1129_v2 }
  0x36   :  { %847 = vmatprep.subr.bf16.mxu1 %v1072_v0  ;;  %838 = vmatpush3.bf16.msra.mxu0 %v1184_v12 }
  0x37   :  { %863 = vmatprep.subr.bf16.mxu0 %v1072_v0 }
  0x39   :  { %848 = vmatpush3.bf16.msra.mxu1 %v1136_v4 }
  0x3a   :  { %849 = vmatprep.subr.bf16.mxu1 %v1072_v0 }
  0x3d   :  { %850 = vmatpush3.bf16.msra.mxu1 %v1143_v7 }
  0x3e   :  { %851 = vmatprep.subr.bf16.mxu1 %v1072_v0 }
  0x41   :  { %852 = vmatpush3.bf16.msra.mxu1 %v1153_v9 }
  0x42   :  { %853 = vmatprep.subr.bf16.mxu1 %v1072_v0 }
  0x45   :  { %854 = vmatpush3.bf16.msra.mxu1 %v1166_v10 }
  0x46   :  { %855 = vmatprep.subr.bf16.mxu1 %v1072_v0 }
  0x49   :  { %856 = vmatpush3.bf16.msra.mxu1 %v1175_v11 }
  0x4a   :  { %857 = vmatprep.subr.bf16.mxu1 %v1072_v0 }
  0x4d   :  { %858 = vmatpush3.bf16.msra.mxu1 %v1184_v12 }
  0x4e   :  { %883 = vmatprep.subr.bf16.mxu1 %v1072_v0 }
  0xd8   :  { %v143_v14 = vpop.f32.mrf.mxu0 }
  0xd9   :  { %v1222_v20 = vadd.f32 %v689_v15, %v143_v14 }
  0xda   :  { %v801_v16 = vpop.f32.mrf.mxu0 }
  0xdc   :  { %v146_v17 = vpop.f32.mrf.mxu0 }
  0xdd   :  { %v1220_v18 = vadd.f32 %v689_v15, %v146_v17 }
  0xde   :  { %v802_v19 = vpop.f32.mrf.mxu0 }
  0xf0   :  { %v232_v21 = vpop.f32.mrf.mxu1 }
  0xf1   :  { %v238_v22 = vadd.f32 %v232_v21, %v1222_v20  ;;  %v1004_v21 = vld [vmem:[%s1364_s4 + $0x20] sm:$0xff]  }
  0xf2   :  { %v821_v23 = vpop.f32.mrf.mxu1 }
  0xf3   :  { %1009 = vtanh.f32 %v238_v22  ;;  %v1005_v22 = vld [vmem:[%s1364_s4 + $0x18] sm:$0xff]   ;;  %v1006_v23 = vld [vmem:[%s1364_s4 + $0x10] sm:$0xff]  }
  0xf4   :  { %v235_v24 = vpop.f32.mrf.mxu1 }
  0xf5   :  { %v1007_v24 = vld [vmem:[%s1364_s4 + $0x8] sm:$0xff]  }
  0xf6   :  { %v822_v25 = vpop.f32.mrf.mxu1 }
  0xf7   :  { %v1008_v25 = vld [vmem:[%s1364_s4] sm:$0xff]  }
 0x100   :  { %v1010_v26 = vpop.eup %1009 }
 0x101   :  { %v240_v27 = vpack.c.bf16 %v1010_v26, %v1010_v26 }
 0x103   :  { %840 = vmatmul.mubr.bf16.vlgmr.msra.gmra.mxu0 %v240_v27 }
 0x104   :  { %864 = vmatpush3.bf16.msra.mxu0 %v1123_v1  ;;  %879 = vmatprep.mubr.msk.bf16.mxu0 %vm1073_vm0, %v1072_v0 }
 0x105   :  { %865 = vmatprep.subr.bf16.mxu0 %v1072_v0 }
 0x108   :  { %866 = vmatpush3.bf16.msra.mxu0 %v1129_v2 }
 0x109   :  { %867 = vmatprep.subr.bf16.mxu0 %v1072_v0 }
 0x10c   :  { %868 = vmatpush3.bf16.msra.mxu0 %v1136_v4 }
 0x10d   :  { %869 = vmatprep.subr.bf16.mxu0 %v1072_v0 }
 0x110   :  { %870 = vmatpush3.bf16.msra.mxu0 %v1143_v7 }
 0x111   :  { %871 = vmatprep.subr.bf16.mxu0 %v1072_v0 }
 0x114   :  { %872 = vmatpush3.bf16.msra.mxu0 %v1153_v9 }
 0x115   :  { %873 = vmatprep.subr.bf16.mxu0 %v1072_v0 }
 0x118   :  { %874 = vmatpush3.bf16.msra.mxu0 %v1166_v10 }
 0x119   :  { %875 = vmatprep.subr.bf16.mxu0 %v1072_v0 }
 0x11c   :  { %876 = vmatpush3.bf16.msra.mxu0 %v1175_v11 }
 0x11d   :  { %877 = vmatprep.subr.bf16.mxu0 %v1072_v0 }
 0x120   :  { %878 = vmatpush3.bf16.msra.mxu0 %v1184_v12 }
 0x121   :  { %903 = vmatprep.subr.bf16.mxu0 %v1072_v0 }
 0x1c3   :  { %v275_v28 = vpop.f32.mrf.mxu0 }
 0x1c4   :  { %v282_v29 = vrot.slane %v275_v28, 6 }
 0x1c5   :  { %v841_v30 = vpop.f32.mrf.mxu0 }
 0x1c6   :  { %v284_v31 = vadd.f32 %v282_v29, %v1222_v20 }
 0x1c7   :  { %v278_v32 = vpop.f32.mrf.mxu0 }
 0x1c8   :  { %1011 = vtanh.f32 %v284_v31 }
 0x1c9   :  { %v842_v33 = vpop.f32.mrf.mxu0 }
 0x1d5   :  { %v1012_v34 = vpop.eup %1011 }
 0x1d6   :  { %v286_v35 = vpack.c.bf16 %v1012_v34, %v1012_v34 }
 0x1d8   :  { %v288_v36 = vrot.slane %v286_v35, 1 }
 0x1da   :  { %860 = vmatmul.mubr.bf16.vlgmr.msra.gmra.mxu1 %v288_v36 }
 0x1db   :  { %884 = vmatpush3.bf16.msra.mxu1 %v1123_v1  ;;  %899 = vmatprep.mubr.msk.bf16.mxu1 %vm1073_vm0, %v1072_v0 }
 0x1dc   :  { %885 = vmatprep.subr.bf16.mxu1 %v1072_v0 }
 0x1df   :  { %886 = vmatpush3.bf16.msra.mxu1 %v1129_v2 }
 0x1e0   :  { %887 = vmatprep.subr.bf16.mxu1 %v1072_v0 }
 0x1e3   :  { %888 = vmatpush3.bf16.msra.mxu1 %v1136_v4 }
 0x1e4   :  { %889 = vmatprep.subr.bf16.mxu1 %v1072_v0 }
 0x1e7   :  { %890 = vmatpush3.bf16.msra.mxu1 %v1143_v7 }
 0x1e8   :  { %891 = vmatprep.subr.bf16.mxu1 %v1072_v0 }
 0x1eb   :  { %892 = vmatpush3.bf16.msra.mxu1 %v1153_v9 }
 0x1ec   :  { %893 = vmatprep.subr.bf16.mxu1 %v1072_v0 }
 0x1ef   :  { %894 = vmatpush3.bf16.msra.mxu1 %v1166_v10 }
 0x1f0   :  { %895 = vmatprep.subr.bf16.mxu1 %v1072_v0 }
 0x1f3   :  { %896 = vmatpush3.bf16.msra.mxu1 %v1175_v11 }
 0x1f4   :  { %897 = vmatprep.subr.bf16.mxu1 %v1072_v0 }
 0x1f7   :  { %898 = vmatpush3.bf16.msra.mxu1 %v1184_v12 }
 0x1f8   :  { %923 = vmatprep.subr.bf16.mxu1 %v1072_v0 }
 0x29a   :  { %v324_v37 = vpop.f32.mrf.mxu1 }
 0x29b   :  { %v331_v38 = vrot.slane %v324_v37, 4 }
 0x29c   :  { %v861_v39 = vpop.f32.mrf.mxu1 }
 0x29d   :  { %v333_v40 = vadd.f32 %v331_v38, %v1222_v20 }
 0x29e   :  { %v327_v41 = vpop.f32.mrf.mxu1 }
 0x29f   :  { %1013 = vtanh.f32 %v333_v40 }
 0x2a0   :  { %v862_v42 = vpop.f32.mrf.mxu1 }
 0x2ac   :  { %v1014_v43 = vpop.eup %1013 }
 0x2ad   :  { %v335_v44 = vpack.c.bf16 %v1014_v43, %v1014_v43 }
 0x2af   :  { %v337_v45 = vrot.slane %v335_v44, 2 }
 0x2b1   :  { %880 = vmatmul.mubr.bf16.vlgmr.msra.gmra.mxu0 %v337_v45 }
 0x2b2   :  { %904 = vmatpush3.bf16.msra.mxu0 %v1123_v1  ;;  %919 = vmatprep.mubr.msk.bf16.mxu0 %vm1073_vm0, %v1072_v0 }
 0x2b3   :  { %905 = vmatprep.subr.bf16.mxu0 %v1072_v0 }
 0x2b6   :  { %906 = vmatpush3.bf16.msra.mxu0 %v1129_v2 }
 0x2b7   :  { %907 = vmatprep.subr.bf16.mxu0 %v1072_v0 }
 0x2ba   :  { %908 = vmatpush3.bf16.msra.mxu0 %v1136_v4 }
 0x2bb   :  { %909 = vmatprep.subr.bf16.mxu0 %v1072_v0 }
 0x2be   :  { %910 = vmatpush3.bf16.msra.mxu0 %v1143_v7 }
 0x2bf   :  { %911 = vmatprep.subr.bf16.mxu0 %v1072_v0 }
 0x2c2   :  { %912 = vmatpush3.bf16.msra.mxu0 %v1153_v9 }
 0x2c3   :  { %913 = vmatprep.subr.bf16.mxu0 %v1072_v0 }
 0x2c6   :  { %914 = vmatpush3.bf16.msra.mxu0 %v1166_v10 }
 0x2c7   :  { %915 = vmatprep.subr.bf16.mxu0 %v1072_v0 }
 0x2ca   :  { %916 = vmatpush3.bf16.msra.mxu0 %v1175_v11 }
 0x2cb   :  { %917 = vmatprep.subr.bf16.mxu0 %v1072_v0 }
 0x2ce   :  { %918 = vmatpush3.bf16.msra.mxu0 %v1184_v12 }
 0x2cf   :  { %943 = vmatprep.subr.bf16.mxu0 %v1072_v0 }
 0x371   :  { %v373_v46 = vpop.f32.mrf.mxu0 }
 0x372   :  { %v380_v47 = vrot.slane %v373_v46, 2 }
 0x373   :  { %v881_v48 = vpop.f32.mrf.mxu0 }
 0x374   :  { %v382_v49 = vadd.f32 %v380_v47, %v1222_v20  ;;  %v1003_v20 = vld [vmem:[%s1364_s4 + $0x28] sm:$0xff]  }
 0x375   :  { %v376_v50 = vpop.f32.mrf.mxu0 }
 0x376   :  { %1015 = vtanh.f32 %v382_v49 }
 0x377   :  { %v882_v51 = vpop.f32.mrf.mxu0 }
 0x383   :  { %v1016_v52 = vpop.eup %1015 }
 0x384   :  { %v384_v53 = vpack.c.bf16 %v1016_v52, %v1016_v52 }
 0x386   :  { %v386_v54 = vrot.slane %v384_v53, 3 }
 0x388   :  { %900 = vmatmul.mubr.bf16.vlgmr.msra.gmra.mxu1 %v386_v54 }
 0x389   :  { %924 = vmatpush3.bf16.msra.mxu1 %v1123_v1  ;;  %939 = vmatprep.mubr.msk.bf16.mxu1 %vm1073_vm0, %v1072_v0 }
 0x38a   :  { %925 = vmatprep.subr.bf16.mxu1 %v1072_v0 }
 0x38d   :  { %926 = vmatpush3.bf16.msra.mxu1 %v1129_v2 }
 0x38e   :  { %927 = vmatprep.subr.bf16.mxu1 %v1072_v0 }
 0x391   :  { %928 = vmatpush3.bf16.msra.mxu1 %v1136_v4 }
 0x392   :  { %929 = vmatprep.subr.bf16.mxu1 %v1072_v0 }
 0x395   :  { %930 = vmatpush3.bf16.msra.mxu1 %v1143_v7 }
 0x396   :  { %931 = vmatprep.subr.bf16.mxu1 %v1072_v0 }
 0x399   :  { %932 = vmatpush3.bf16.msra.mxu1 %v1153_v9 }
 0x39a   :  { %933 = vmatprep.subr.bf16.mxu1 %v1072_v0 }
 0x39d   :  { %934 = vmatpush3.bf16.msra.mxu1 %v1166_v10 }
 0x39e   :  { %935 = vmatprep.subr.bf16.mxu1 %v1072_v0 }
 0x3a1   :  { %936 = vmatpush3.bf16.msra.mxu1 %v1175_v11 }
 0x3a2   :  { %937 = vmatprep.subr.bf16.mxu1 %v1072_v0 }
 0x3a5   :  { %938 = vmatpush3.bf16.msra.mxu1 %v1184_v12 }
 0x3a6   :  { %963 = vmatprep.subr.bf16.mxu1 %v1072_v0 }
 0x448   :  { %v422_v55 = vpop.f32.mrf.mxu1 }
 0x449   :  { %v428_v56 = vadd.f32 %v422_v55, %v1220_v18 }
 0x44a   :  { %v901_v57 = vpop.f32.mrf.mxu1 }
 0x44b   :  { %1017 = vtanh.f32 %v428_v56 }
 0x44c   :  { %v425_v58 = vpop.f32.mrf.mxu1 }
 0x44e   :  { %v902_v59 = vpop.f32.mrf.mxu1 }
 0x458   :  { %v1018_v60 = vpop.eup %1017 }
 0x459   :  { %v430_v61 = vpack.c.bf16 %v1018_v60, %v1018_v60 }
 0x45b   :  { %920 = vmatmul.mubr.bf16.vlgmr.msra.gmra.mxu0 %v430_v61 }
 0x45c   :  { %944 = vmatpush3.bf16.msra.mxu0 %v1123_v1  ;;  %959 = vmatprep.mubr.msk.bf16.mxu0 %vm1073_vm0, %v1072_v0 }
 0x45d   :  { %945 = vmatprep.subr.bf16.mxu0 %v1072_v0 }
 0x460   :  { %946 = vmatpush3.bf16.msra.mxu0 %v1129_v2 }
 0x461   :  { %947 = vmatprep.subr.bf16.mxu0 %v1072_v0 }
 0x464   :  { %948 = vmatpush3.bf16.msra.mxu0 %v1136_v4 }
 0x465   :  { %949 = vmatprep.subr.bf16.mxu0 %v1072_v0 }
 0x468   :  { %950 = vmatpush3.bf16.msra.mxu0 %v1143_v7 }
 0x469   :  { %951 = vmatprep.subr.bf16.mxu0 %v1072_v0 }
 0x46c   :  { %952 = vmatpush3.bf16.msra.mxu0 %v1153_v9  ;;  %v1002_v9 = vld [vmem:[%s1364_s4 + $0x30] sm:$0xff]   ;;  %s1045_s4 = scalar_lea.vmem %s681_s14, 32 }
 0x46d   :  { %953 = vmatprep.subr.bf16.mxu0 %v1072_v0  ;;  %p1046_p5 = scmp.ne.s32.totalorder %s681_s14, %s1045_s4  ;;  %p1051_p7 = scmp.lt.s32.totalorder %s1045_s4, %s1045_s4 }
 0x46f   :  { %p1052_p8 = por %p1051_p7, %p1050_p6 }
 0x470   :  { %954 = vmatpush3.bf16.msra.mxu0 %v1166_v10 }
 0x471   :  { %955 = vmatprep.subr.bf16.mxu0 %v1072_v0  ;;  %p1053_p9 = pnand %p1052_p8, %p1046_p5 }
 0x474   :  { %956 = vmatpush3.bf16.msra.mxu0 %v1175_v11 }
 0x475   :  { %957 = vmatprep.subr.bf16.mxu0 %v1072_v0 }
 0x478   :  { %958 = vmatpush3.bf16.msra.mxu0 %v1184_v12 }
 0x51b   :  { %v465_v62 = vpop.f32.mrf.mxu0 }
 0x51c   :  { %v472_v63 = vrot.slane %v465_v62, 6 }
 0x51d   :  { %v921_v1 = vpop.f32.mrf.mxu0 }
 0x51e   :  { %v474_v2 = vadd.f32 %v472_v63, %v1220_v18 }
 0x51f   :  { %v468_v3 = vpop.f32.mrf.mxu0 }
 0x520   :  { %1019 = vtanh.f32 %v474_v2 }
 0x521   :  { %v922_v4 = vpop.f32.mrf.mxu0 }
 0x52d   :  { %v1020_v5 = vpop.eup %1019 }
 0x52e   :  { %v476_v6 = vpack.c.bf16 %v1020_v5, %v1020_v5 }
 0x530   :  { %v478_v7 = vrot.slane %v476_v6, 1 }
 0x532   :  { %940 = vmatmul.mubr.bf16.vlgmr.msra.gmra.mxu1 %v478_v7 }
 0x533   :  { %979 = vmatprep.mubr.msk.bf16.mxu1 %vm1073_vm0, %v1072_v0  ;;  %964 = vmatpush3.bf16.msra.mxu1 %v1001_v8 }
 0x534   :  { %965 = vmatprep.subr.bf16.mxu1 %v1072_v0 }
 0x537   :  { %966 = vmatpush3.bf16.msra.mxu1 %v1002_v9 }
 0x538   :  { %967 = vmatprep.subr.bf16.mxu1 %v1072_v0 }
 0x53b   :  { %968 = vmatpush3.bf16.msra.mxu1 %v1003_v20 }
 0x53c   :  { %969 = vmatprep.subr.bf16.mxu1 %v1072_v0 }
 0x53f   :  { %970 = vmatpush3.bf16.msra.mxu1 %v1004_v21 }
 0x540   :  { %971 = vmatprep.subr.bf16.mxu1 %v1072_v0 }
 0x543   :  { %972 = vmatpush3.bf16.msra.mxu1 %v1005_v22 }
 0x544   :  { %973 = vmatprep.subr.bf16.mxu1 %v1072_v0 }
 0x547   :  { %974 = vmatpush3.bf16.msra.mxu1 %v1006_v23 }
 0x548   :  { %975 = vmatprep.subr.bf16.mxu1 %v1072_v0 }
 0x54b   :  { %976 = vmatpush3.bf16.msra.mxu1 %v1007_v24 }
 0x54c   :  { %977 = vmatprep.subr.bf16.mxu1 %v1072_v0  ;;  %v702_v0 = vld [vmem:[%s1365_s5] ss:$0 sm:$0xff] }
 0x54f   :  { %978 = vmatpush3.bf16.msra.mxu1 %v1008_v25 }
 0x5f2   :  { %v514_v10 = vpop.f32.mrf.mxu1 }
 0x5f3   :  { %v521_v11 = vrot.slane %v514_v10, 4 }
 0x5f4   :  { %v941_v12 = vpop.f32.mrf.mxu1 }
 0x5f5   :  { %v523_v13 = vadd.f32 %v521_v11, %v1220_v18 }
 0x5f6   :  { %v517_v14 = vpop.f32.mrf.mxu1 }
 0x5f7   :  { %1021 = vtanh.f32 %v523_v13 }
 0x5f8   :  { %v942_v15 = vpop.f32.mrf.mxu1 }
 0x604   :  { %v1022_v16 = vpop.eup %1021 }
 0x605   :  { %v525_v17 = vpack.c.bf16 %v1022_v16, %v1022_v16 }
 0x607   :  { %v527_v19 = vrot.slane %v525_v17, 2 }
 0x609   :  { %960 = vmatmul.mubr.bf16.vlgmr.msra.gmra.mxu0 %v527_v19 }
 0x6c9   :  { %v563_v26 = vpop.f32.mrf.mxu0 }
 0x6ca   :  { %v570_v27 = vrot.slane %v563_v26, 2 }
 0x6cb   :  { %v961_v28 = vpop.f32.mrf.mxu0 }
 0x6cc   :  { %v572_v29 = vadd.f32 %v570_v27, %v1220_v18 }
 0x6cd   :  { %v566_v30 = vpop.f32.mrf.mxu0 }
 0x6ce   :  { %1023 = vtanh.f32 %v572_v29 }
 0x6cf   :  { %v962_v31 = vpop.f32.mrf.mxu0 }
 0x6db   :  { %v1024_v32 = vpop.eup %1023 }
 0x6dc   :  { %v574_v33 = vpack.c.bf16 %v1024_v32, %v1024_v32 }
 0x6de   :  { %v582_v34 = vrot.slane %v574_v33, 3 }
 0x6e0   :  { %980 = vmatmul.mubr.bf16.vlgmr.msra.gmra.mxu1 %v582_v34 }
 0x7a0   :  { %v666_v35 = vpop.f32.mrf.mxu1 }
 0x7a1   :  { %v667_v36 = vadd.f32 %v702_v0, %v666_v35 }
 0x7a2   :  { %v981_v37 = vpop.f32.mrf.mxu1 }
 0x7a3   :  { %673 = vst.msk [vmem:[#allocation5] sm:$0x3] %vm672_vm3, %v667_v36 }
 0x7a4   :  { %v669_v18 = vpop.f32.mrf.mxu1 }
 0x7a5   :  { %1056 = shalt.err (!%p1053_p9)
}
 0x7a6   :  { %683 = dma.vmem_to_hbm [thread:$0]  %s681_s14, 32, %s1366_s6, [#allocation4]   ;;  %v982_v38 = vpop.f32.mrf.mxu1 }
 0x7a7   :  { %1067 = dma.done.wait [#allocation4], 32  }
 0x7a8   :  { %1068 = vsyncadd [#allocation4], 4294967264 }
 0x7a9   :  { %687 = vsyncpa [#allocation3], 1 }
 0x7aa   :  { %688 = vsyncpa [#allocation4], 1 }

</bundles_post_ra>
